<compile_context>
chip_gen: v5e
topology: v5e:2x2
jax: 0.10.0
libtpu: 0.0.40
codegen_flags: <defaults>
</compile_context>

<pallas_src>
import functools

import jax
import jax.numpy as jnp
from jax.experimental import pallas as pl
from jax.experimental.pallas import tpu as pltpu

IN_DIM = 11
H1, H2, H3 = 32, 64, 32
OUT_DIM = 42


def _round_up(x, m):
    return ((x + m - 1) // m) * m


def mlp_kernel(x_ref,
               w1_ref, b1_ref,
               w2_ref, b2_ref,
               w3_ref, b3_ref,
               w4_ref, b4_ref,
               o_ref):
    # Weights arrive in bf16; activations are cast to bf16 only at the MXU
    # inputs. Accumulation, bias add and ReLU stay f32 (VPU-friendly on v5e too).
    x = x_ref[...].astype(jnp.bfloat16)

    h = jnp.dot(x, w1_ref[...], preferred_element_type=jnp.float32) + b1_ref[...]
    h = jnp.maximum(h, 0.0)

    h = jnp.dot(h.astype(jnp.bfloat16), w2_ref[...],
                preferred_element_type=jnp.float32) + b2_ref[...]
    h = jnp.maximum(h, 0.0)

    h = jnp.dot(h.astype(jnp.bfloat16), w3_ref[...],
                preferred_element_type=jnp.float32) + b3_ref[...]
    h = jnp.maximum(h, 0.0)

    h = jnp.dot(h.astype(jnp.bfloat16), w4_ref[...],
                preferred_element_type=jnp.float32) + b4_ref[...]

    o_ref[...] = h.astype(o_ref.dtype)


@functools.partial(jax.jit, static_argnames=("tile_batch",))
def mynetwork3_forward(x, params, *, tile_batch=1024):
    """x: [B, 11] float32; params: dict of w{i} [in,out] f32 and b{i} [1,out] f32."""
    B = x.shape[0]

    # bf16 weights (native MXU path; halves the one-shot weight DMA).
    bf = jnp.bfloat16
    w1 = params["w1"].astype(bf)
    w2 = params["w2"].astype(bf)
    w3 = params["w3"].astype(bf)
    w4 = params["w4"].astype(bf)
    b1, b2, b3, b4 = params["b1"], params["b2"], params["b3"], params["b4"]

    # Batch tile: large (per-grid-step overhead amortization) but clamped to the
    # sublane-rounded batch so tiny batches don't pay for useless padding.
    TB = min(int(tile_batch), _round_up(B, 8))
    TB = _round_up(TB, 8)
    B_pad = _round_up(B, TB)
    if B_pad != B:
        x = jnp.pad(x, ((0, B_pad - B), (0, 0)))
    grid = (B_pad // TB,)

    def batch_map(i):
        return (i, 0)

    def const_map(i):
        return (0, 0)

    flops = 2 * B_pad * (IN_DIM * H1 + H1 * H2 + H2 * H3 + H3 * OUT_DIM)
    weight_bytes = (IN_DIM * H1 + H1 * H2 + H2 * H3 + H3 * OUT_DIM) * 2 \
        + (H1 + H2 + H3 + OUT_DIM) * 4
    bytes_accessed = B_pad * IN_DIM * 4 + B_pad * OUT_DIM * 4 + weight_bytes

    out = pl.pallas_call(
        mlp_kernel,
        out_shape=jax.ShapeDtypeStruct((B_pad, OUT_DIM), jnp.float32),
        grid_spec=pltpu.PrefetchScalarGridSpec(
            num_scalar_prefetch=0,
            grid=grid,
            in_specs=[
                pl.BlockSpec((TB, IN_DIM), batch_map),
                pl.BlockSpec((IN_DIM, H1), const_map),
                pl.BlockSpec((1, H1), const_map),
                pl.BlockSpec((H1, H2), const_map),
                pl.BlockSpec((1, H2), const_map),
                pl.BlockSpec((H2, H3), const_map),
                pl.BlockSpec((1, H3), const_map),
                pl.BlockSpec((H3, OUT_DIM), const_map),
                pl.BlockSpec((1, OUT_DIM), const_map),
            ],
            out_specs=pl.BlockSpec((TB, OUT_DIM), batch_map),
        ),
        compiler_params=pltpu.CompilerParams(
            dimension_semantics=("parallel",)),
        cost_estimate=pl.CostEstimate(
            flops=flops, transcendentals=0, bytes_accessed=bytes_accessed),
    )(x, w1, b1, w2, b2, w3, b3, w4, b4)

    if B_pad != B:
        out = out[:B]
    return out


def init_params(key):
    """Deterministic init mimicking PyTorch's default Linear init (U(-1/sqrt(fan_in), +))."""
    dims = [(IN_DIM, H1), (H1, H2), (H2, H3), (H3, OUT_DIM)]
    params = {}
    keys = jax.random.split(key, 2 * len(dims))
    for i, (fan_in, fan_out) in enumerate(dims):
        bound = 1.0 / jnp.sqrt(fan_in)
        w = jax.random.uniform(keys[2 * i], (fan_in, fan_out),
                               dtype=jnp.float32, minval=-bound, maxval=bound)
        b = jax.random.uniform(keys[2 * i + 1], (1, fan_out),
                               dtype=jnp.float32, minval=-bound, maxval=bound)
        params[f"w{i + 1}"] = w
        params[f"b{i + 1}"] = b
    return params


def reference_forward_f32(x, params):
    h = jnp.maximum(x @ params["w1"] + params["b1"], 0.0)
    h = jnp.maximum(h @ params["w2"] + params["b2"], 0.0)
    h = jnp.maximum(h @ params["w3"] + params["b3"], 0.0)
    return h @ params["w4"] + params["b4"]


def reference_forward_bf16(x, params):
    """Reference with the same bf16-input / f32-accumulate quantization as the kernel."""
    bf = jnp.bfloat16

    def lin(h, w, b):
        return jnp.dot(h.astype(bf), w.astype(bf),
                       preferred_element_type=jnp.float32) + b

    h = jnp.maximum(lin(x, params["w1"], params["b1"]), 0.0)
    h = jnp.maximum(lin(h, params["w2"], params["b2"]), 0.0)
    h = jnp.maximum(lin(h, params["w3"], params["b3"]), 0.0)
    return lin(h, params["w4"], params["b4"])


if __name__ == "__main__":
    key = jax.random.PRNGKey(0)
    k_params, k_x1, k_x2 = jax.random.split(key, 3)
    params = init_params(k_params)

    # Small smoke test (single grid step).
    B = 8
    x = jax.random.normal(k_x1, (B, IN_DIM), dtype=jnp.float32)
    out = jax.block_until_ready(mynetwork3_forward(x, params))
    assert out.shape == (B, OUT_DIM)
    assert jnp.allclose(out, reference_forward_bf16(x, params), atol=2e-3, rtol=2e-3)
    assert jnp.allclose(out, reference_forward_f32(x, params), atol=5e-2, rtol=5e-2)

    # Exercise the batch grid + padding path (grid > 1, non-multiple batch).
    B2 = 200
    x2 = jax.random.normal(k_x2, (B2, IN_DIM), dtype=jnp.float32)
    out2 = jax.block_until_ready(mynetwork3_forward(x2, params, tile_batch=64))
    assert out2.shape == (B2, OUT_DIM)
    assert jnp.allclose(out2, reference_forward_bf16(x2, params), atol=2e-3, rtol=2e-3)
    assert jnp.allclose(out2, reference_forward_f32(x2, params), atol=5e-2, rtol=5e-2)

    print("KERNEL_OK")
</pallas_src>

<mosaic_0001>
module attributes {stable_mosaic.version = 11 : i64} {
  func.func @mlp_kernel(%arg0: i32, %arg1: memref<8x11xf32, #tpu.memory_space<vmem>>, %arg2: memref<11x32xbf16, #tpu.memory_space<vmem>>, %arg3: memref<1x32xf32, #tpu.memory_space<vmem>>, %arg4: memref<32x64xbf16, #tpu.memory_space<vmem>>, %arg5: memref<1x64xf32, #tpu.memory_space<vmem>>, %arg6: memref<64x32xbf16, #tpu.memory_space<vmem>>, %arg7: memref<1x32xf32, #tpu.memory_space<vmem>>, %arg8: memref<32x42xbf16, #tpu.memory_space<vmem>>, %arg9: memref<1x42xf32, #tpu.memory_space<vmem>>, %arg10: memref<8x42xf32, #tpu.memory_space<vmem>>) attributes {dimension_semantics = [#tpu.dimension_semantics<parallel>], iteration_bounds = array<i64: 1>, scalar_prefetch = 0 : i64, scratch_operands = 0 : i64, tpu.core_type = #tpu.core_type<tc>, window_params = [{transform_indices = @transform_0, window_bounds = array<i64: 8, 11>}, {pipeline_mode = #tpu.pipeline_mode<synchronous>, transform_indices = @transform_1, window_bounds = array<i64: 11, 32>}, {pipeline_mode = #tpu.pipeline_mode<synchronous>, transform_indices = @transform_2, window_bounds = array<i64: 1, 32>}, {pipeline_mode = #tpu.pipeline_mode<synchronous>, transform_indices = @transform_3, window_bounds = array<i64: 32, 64>}, {pipeline_mode = #tpu.pipeline_mode<synchronous>, transform_indices = @transform_4, window_bounds = array<i64: 1, 64>}, {pipeline_mode = #tpu.pipeline_mode<synchronous>, transform_indices = @transform_5, window_bounds = array<i64: 64, 32>}, {pipeline_mode = #tpu.pipeline_mode<synchronous>, transform_indices = @transform_6, window_bounds = array<i64: 1, 32>}, {pipeline_mode = #tpu.pipeline_mode<synchronous>, transform_indices = @transform_7, window_bounds = array<i64: 32, 42>}, {pipeline_mode = #tpu.pipeline_mode<synchronous>, transform_indices = @transform_8, window_bounds = array<i64: 1, 42>}, {transform_indices = @transform_9, window_bounds = array<i64: 8, 42>}]} {
    %c0 = arith.constant 0 : index
    %c0_0 = arith.constant 0 : index
    %0 = vector.load %arg1[%c0, %c0_0] : memref<8x11xf32, #tpu.memory_space<vmem>>, vector<8x11xf32>
    %1 = arith.truncf %0 : vector<8x11xf32> to vector<8x11xbf16>
    %c0_1 = arith.constant 0 : index
    %c0_2 = arith.constant 0 : index
    %2 = vector.load %arg2[%c0_1, %c0_2] : memref<11x32xbf16, #tpu.memory_space<vmem>>, vector<11x32xbf16>
    %cst = arith.constant dense<0.000000e+00> : vector<8x32xf32>
    %3 = tpu.matmul %1, %2, %cst {dimension_numbers = #tpu.dot_dimension_numbers<[1], [0], [0], [1], [0, 0, 1, 1], [], []>} : vector<8x11xbf16>, vector<11x32xbf16>, vector<8x32xf32> -> vector<8x32xf32>
    %c0_3 = arith.constant 0 : index
    %c0_4 = arith.constant 0 : index
    %4 = vector.load %arg3[%c0_3, %c0_4] : memref<1x32xf32, #tpu.memory_space<vmem>>, vector<1x32xf32>
    %5 = vector.broadcast %4 : vector<1x32xf32> to vector<8x32xf32>
    %6 = arith.addf %3, %5 : vector<8x32xf32>
    %cst_5 = arith.constant 0.000000e+00 : f32
    %7 = vector.broadcast %cst_5 : f32 to vector<8x32xf32>
    %8 = arith.maximumf %6, %7 : vector<8x32xf32>
    %9 = arith.truncf %8 : vector<8x32xf32> to vector<8x32xbf16>
    %c0_6 = arith.constant 0 : index
    %c0_7 = arith.constant 0 : index
    %10 = vector.load %arg4[%c0_6, %c0_7] : memref<32x64xbf16, #tpu.memory_space<vmem>>, vector<32x64xbf16>
    %cst_8 = arith.constant dense<0.000000e+00> : vector<8x64xf32>
    %11 = tpu.matmul %9, %10, %cst_8 {dimension_numbers = #tpu.dot_dimension_numbers<[1], [0], [0], [1], [0, 0, 1, 1], [], []>} : vector<8x32xbf16>, vector<32x64xbf16>, vector<8x64xf32> -> vector<8x64xf32>
    %c0_9 = arith.constant 0 : index
    %c0_10 = arith.constant 0 : index
    %12 = vector.load %arg5[%c0_9, %c0_10] : memref<1x64xf32, #tpu.memory_space<vmem>>, vector<1x64xf32>
    %13 = vector.broadcast %12 : vector<1x64xf32> to vector<8x64xf32>
    %14 = arith.addf %11, %13 : vector<8x64xf32>
    %cst_11 = arith.constant 0.000000e+00 : f32
    %15 = vector.broadcast %cst_11 : f32 to vector<8x64xf32>
    %16 = arith.maximumf %14, %15 : vector<8x64xf32>
    %17 = arith.truncf %16 : vector<8x64xf32> to vector<8x64xbf16>
    %c0_12 = arith.constant 0 : index
    %c0_13 = arith.constant 0 : index
    %18 = vector.load %arg6[%c0_12, %c0_13] : memref<64x32xbf16, #tpu.memory_space<vmem>>, vector<64x32xbf16>
    %cst_14 = arith.constant dense<0.000000e+00> : vector<8x32xf32>
    %19 = tpu.matmul %17, %18, %cst_14 {dimension_numbers = #tpu.dot_dimension_numbers<[1], [0], [0], [1], [0, 0, 1, 1], [], []>} : vector<8x64xbf16>, vector<64x32xbf16>, vector<8x32xf32> -> vector<8x32xf32>
    %c0_15 = arith.constant 0 : index
    %c0_16 = arith.constant 0 : index
    %20 = vector.load %arg7[%c0_15, %c0_16] : memref<1x32xf32, #tpu.memory_space<vmem>>, vector<1x32xf32>
    %21 = vector.broadcast %20 : vector<1x32xf32> to vector<8x32xf32>
    %22 = arith.addf %19, %21 : vector<8x32xf32>
    %cst_17 = arith.constant 0.000000e+00 : f32
    %23 = vector.broadcast %cst_17 : f32 to vector<8x32xf32>
    %24 = arith.maximumf %22, %23 : vector<8x32xf32>
    %25 = arith.truncf %24 : vector<8x32xf32> to vector<8x32xbf16>
    %c0_18 = arith.constant 0 : index
    %c0_19 = arith.constant 0 : index
    %26 = vector.load %arg8[%c0_18, %c0_19] : memref<32x42xbf16, #tpu.memory_space<vmem>>, vector<32x42xbf16>
    %cst_20 = arith.constant dense<0.000000e+00> : vector<8x42xf32>
    %27 = tpu.matmul %25, %26, %cst_20 {dimension_numbers = #tpu.dot_dimension_numbers<[1], [0], [0], [1], [0, 0, 1, 1], [], []>} : vector<8x32xbf16>, vector<32x42xbf16>, vector<8x42xf32> -> vector<8x42xf32>
    %c0_21 = arith.constant 0 : index
    %c0_22 = arith.constant 0 : index
    %28 = vector.load %arg9[%c0_21, %c0_22] : memref<1x42xf32, #tpu.memory_space<vmem>>, vector<1x42xf32>
    %29 = vector.broadcast %28 : vector<1x42xf32> to vector<8x42xf32>
    %30 = arith.addf %27, %29 : vector<8x42xf32>
    %c0_23 = arith.constant 0 : index
    %c0_24 = arith.constant 0 : index
    %31 = vector.load %arg10[%c0_23, %c0_24] : memref<8x42xf32, #tpu.memory_space<vmem>>, vector<8x42xf32>
    tpu.vector_store %arg10[%c0_23, %c0_24], %30 {strides = array<i32>} : memref<8x42xf32, #tpu.memory_space<vmem>>, vector<8x42xf32>,
    return
  }
  func.func @transform_0(%arg0: i32) -> (i32, i32) {
    %c0_i32 = arith.constant 0 : i32
    %c0_i32_0 = arith.constant 0 : i32
    return %arg0, %c0_i32 : i32, i32
  }
  func.func @transform_1(%arg0: i32) -> (i32, i32) {
    %c0_i32 = arith.constant 0 : i32
    %c0_i32_0 = arith.constant 0 : i32
    %c0_i32_1 = arith.constant 0 : i32
    return %c0_i32, %c0_i32_0 : i32, i32
  }
  func.func @transform_2(%arg0: i32) -> (i32, i32) {
    %c0_i32 = arith.constant 0 : i32
    %c0_i32_0 = arith.constant 0 : i32
    %c0_i32_1 = arith.constant 0 : i32
    return %c0_i32, %c0_i32_0 : i32, i32
  }
  func.func @transform_3(%arg0: i32) -> (i32, i32) {
    %c0_i32 = arith.constant 0 : i32
    %c0_i32_0 = arith.constant 0 : i32
    %c0_i32_1 = arith.constant 0 : i32
    return %c0_i32, %c0_i32_0 : i32, i32
  }
  func.func @transform_4(%arg0: i32) -> (i32, i32) {
    %c0_i32 = arith.constant 0 : i32
    %c0_i32_0 = arith.constant 0 : i32
    %c0_i32_1 = arith.constant 0 : i32
    return %c0_i32, %c0_i32_0 : i32, i32
  }
  func.func @transform_5(%arg0: i32) -> (i32, i32) {
    %c0_i32 = arith.constant 0 : i32
    %c0_i32_0 = arith.constant 0 : i32
    %c0_i32_1 = arith.constant 0 : i32
    return %c0_i32, %c0_i32_0 : i32, i32
  }
  func.func @transform_6(%arg0: i32) -> (i32, i32) {
    %c0_i32 = arith.constant 0 : i32
    %c0_i32_0 = arith.constant 0 : i32
    %c0_i32_1 = arith.constant 0 : i32
    return %c0_i32, %c0_i32_0 : i32, i32
  }
  func.func @transform_7(%arg0: i32) -> (i32, i32) {
    %c0_i32 = arith.constant 0 : i32
    %c0_i32_0 = arith.constant 0 : i32
    %c0_i32_1 = arith.constant 0 : i32
    return %c0_i32, %c0_i32_0 : i32, i32
  }
  func.func @transform_8(%arg0: i32) -> (i32, i32) {
    %c0_i32 = arith.constant 0 : i32
    %c0_i32_0 = arith.constant 0 : i32
    %c0_i32_1 = arith.constant 0 : i32
    return %c0_i32, %c0_i32_0 : i32, i32
  }
  func.func @transform_9(%arg0: i32) -> (i32, i32) {
    %c0_i32 = arith.constant 0 : i32
    %c0_i32_0 = arith.constant 0 : i32
    return %arg0, %c0_i32 : i32, i32
  }
}

</mosaic_0001>

<bundles_post_ra>
// kernel: mynetwork3_forward.1
= control target key start
LH: loop header
LB: loop body
LE: loop exit
PB: predicated region body
PF: predicated region fallthrough
CT: control target
= control target key end

     0   :  { %vm51_vm0 = vcmask 1044480   ;;  %vm52_vm1 = vcmask 1045504   ;;  %v302_v3 = vmov 65535   ;;  %s404_s0 = inlined_call_operand.vmem [shape: f32[8,11], index: 0, kind: input, shape index: {}]   ;;  %s405_s1 = inlined_call_operand.vmem [shape: bf16[11,32], index: 1, kind: input, shape index: {}]   ;;  %s406_s2 = inlined_call_operand.vmem [shape: f32[1,32], index: 2, kind: input, shape index: {}]   ;;  %s407_s3 = inlined_call_operand.vmem [shape: bf16[32,64], index: 3, kind: input, shape index: {}]   ;;  %s408_s4 = inlined_call_operand.vmem [shape: f32[1,64], index: 4, kind: input, shape index: {}]   ;;  %s409_s5 = inlined_call_operand.vmem [shape: bf16[64,32], index: 5, kind: input, shape index: {}]   ;;  %s410_s6 = inlined_call_operand.vmem [shape: f32[1,32], index: 6, kind: input, shape index: {}]   ;;  %s411_s7 = inlined_call_operand.vmem [shape: bf16[32,42], index: 7, kind: input, shape index: {}]   ;;  %s412_s8 = inlined_call_operand.vmem [shape: f32[1,42], index: 8, kind: input, shape index: {}]   ;;  %s413_s9 = inlined_call_operand.hbm [shape: f32[8,42], index: 9, kind: output, shape index: {}]  }
   0x1   :  { %v223_v0 = vld [vmem:[%s405_s1] sm:$0xf]  ;;  %v261_v1 = vld [vmem:[%s405_s1] sm:$0x30]  ;;  %v53_v4 = vsel %vm51_vm0, 4294967295, %v302_v3 }
   0x2   :  { %v224_v2 = vor.u32 %v261_v1, %v223_v0  ;;  %v34_v5 = vld [vmem:[%s404_s0] sm:$0xff]  ;;  %v54_v6 = vsel %vm52_vm1, %v53_v4, 0 }
   0x4   :  { %v56_v7 = vand.u32 %v224_v2, %v54_v6 }
   0x5   :  { %14 = vsyncpa [#allocation3], 0  ;;  %v35_v8 = vpack.c.bf16 %v34_v5, %v34_v5  ;;  %vm47_vm2 = vcmask 89088   ;;  %v263_v9 = vld [vmem:[%s407_s3 + $0x8] sm:$0xff]  ;;  %v262_v10 = vld [vmem:[%s407_s3] sm:$0xff]  ;;  %vm93_vm3 = vcmask 261120  }
   0x6   :  { %65 = vmatpush.bf16.msra.mxu0 %v56_v7  ;;  %103 = vmatpush.bf16.msra.mxu1 %v263_v9  ;;  %v267_v11 = vld [vmem:[%s409_s5 + $0x18] sm:$0xff]  ;;  %v266_v12 = vld [vmem:[%s409_s5 + $0x10] sm:$0xff]  ;;  %v272_v13 = vld [vmem:[%s406_s2] ss:$0 sm:$0xff]  ;;  %vm148_vm4 = vcmask 523264   ;;  %s303_s12 = smov [#allocation2]  }
   0x7   :  { %156 = vmatpush.bf16.msra.mxu2 %v267_v11  ;;  %v265_v19 = vld [vmem:[%s409_s5 + $0x8] sm:$0xff]  ;;  %v264_v20 = vld [vmem:[%s409_s5] sm:$0xff]  ;;  %s210_s13 = sshll.u32 %s303_s12, 4  ;;  %s212_s15 = sshll.u32 %s413_s9, 4  ;;  %vm203_vm5 = vcmask 343040   ;;  %s211_s13 = int_to_ptr.vmem [resolvable:$true] %s210_s13  ;;  %s213_s15 = int_to_ptr.hbm [resolvable:$true] %s212_s15 }
   0x8   :  { %v273_v21 = vld [vmem:[%s408_s4] ss:$0 sm:$0xff]  ;;  %v269_v27 = vld [vmem:[%s411_s7 + $0x8] sm:$0xff] }
   0x9   :  { %225 = vmatmul.msk.bf16.vlgmr.msra.gmra.mxu0 %vm47_vm2, %v35_v8  ;;  %196 = vmatpush.bf16.msra.mxu3 %v269_v27  ;;  %v268_v28 = vld [vmem:[%s411_s7] sm:$0xff] }
   0xa   :  { %104 = vmatpush.bf16.msra.mxu1 %v262_v10  ;;  %v274_v29 = vld [vmem:[%s410_s6] ss:$0 sm:$0xff] }
   0xb   :  { %157 = vmatpush.bf16.msra.mxu2 %v266_v12  ;;  %v275_v35 = vld [vmem:[%s412_s8] ss:$0 sm:$0xff] }
   0xd   :  { %197 = vmatpush.bf16.msra.mxu3 %v268_v28 }
   0xf   :  { %158 = vmatpush.bf16.msra.mxu2 %v265_v19 }
  0x13   :  { %159 = vmatpush.bf16.msra.mxu2 %v264_v20 }
  0x86   :  { %v67_v14 = vpop.f32.mrf.mxu0 }
  0x87   :  { %v68_v15 = vadd.f32 %v272_v13, %v67_v14 }
  0x89   :  { %v71_v16 = vmax.f32 %v68_v15, 0.0 }
  0x8b   :  { %v72_v17 = vpack.c.bf16 %v71_v16, %v71_v16 }
  0x8d   :  { %234 = vmatmul.msk.bf16.vlgmr.msra.gmra.mxu1 %vm93_vm3, %v72_v17 }
  0x8e   :  { %v69_v18 = vpop.f32.mrf.mxu0 }
 0x10a   :  { %v106_v22 = vpop.f32.mrf.mxu1 }
 0x10b   :  { %v107_v23 = vadd.f32 %v273_v21, %v106_v22 }
 0x10d   :  { %v110_v24 = vmax.f32 %v107_v23, 0.0 }
 0x10f   :  { %v111_v25 = vpack.c.bf16 %v110_v24, %v110_v24 }
 0x111   :  { %251 = vmatmul.msk.bf16.vlgmr.msra.gmra.mxu2 %vm148_vm4, %v111_v25 }
 0x112   :  { %v108_v26 = vpop.f32.mrf.mxu1 }
 0x194   :  { %v161_v30 = vpop.f32.mrf.mxu2 }
 0x195   :  { %v162_v31 = vadd.f32 %v274_v29, %v161_v30 }
 0x197   :  { %v165_v32 = vmax.f32 %v162_v31, 0.0 }
 0x199   :  { %v166_v33 = vpack.c.bf16 %v165_v32, %v165_v32 }
 0x19b   :  { %260 = vmatmul.msk.bf16.vlgmr.msra.gmra.mxu3 %vm93_vm3, %v166_v33 }
 0x19c   :  { %v163_v34 = vpop.f32.mrf.mxu2 }
 0x21e   :  { %v199_v36 = vpop.f32.mrf.mxu3 }
 0x21f   :  { %v200_v37 = vadd.f32 %v275_v35, %v199_v36 }
 0x221   :  { %204 = vst.msk [vmem:[#allocation2] sm:$0xff] %vm203_vm5, %v200_v37 }
 0x222   :  { %215 = dma.vmem_to_hbm [thread:$0]  %s211_s13, 128, %s213_s15, [#allocation3]  }
 0x226   :  { %v201_v38 = vpop.f32.mrf.mxu3 }
 0x227   :  { %300 = dma.done.wait [#allocation3], 128  }
 0x228   :  { %301 = vsyncadd [#allocation3], 4294967168 }
 0x229   :  { %220 = vsyncpa [#allocation3], 1 }

</bundles_post_ra>
